<compile_context>
chip_gen: v5e
topology: v5e:2x2
jax: 0.10.0
libtpu: 0.0.40
codegen_flags: <defaults>
</compile_context>

<pallas_src>
import functools

import jax
import jax.numpy as jnp
from jax.experimental import pallas as pl
from jax.experimental.pallas import tpu as pltpu


def _round_up(x, m):
    return (x + m - 1) // m * m


def _mlp_kernel(x_ref, w1_ref, b1_ref, w2_ref, b2_ref, w3_ref, b3_ref, o_ref):
    # Fused fc1 -> relu -> fc2 -> relu -> fc3 on one (block_m, E) row tile.
    # Matmuls run bf16 on the MXU with f32 accumulation; bias/ReLU in f32.
    x = x_ref[...]
    h = jnp.dot(x, w1_ref[...], preferred_element_type=jnp.float32) + b1_ref[...]
    h = jnp.maximum(h, 0.0).astype(w2_ref.dtype)
    h = jnp.dot(h, w2_ref[...], preferred_element_type=jnp.float32) + b2_ref[...]
    h = jnp.maximum(h, 0.0).astype(w3_ref.dtype)
    y = jnp.dot(h, w3_ref[...], preferred_element_type=jnp.float32) + b3_ref[...]
    o_ref[...] = y.astype(o_ref.dtype)


@functools.partial(jax.jit, static_argnames=("block_m", "single_buffer_weights"))
def _mlp_forward_impl(x, w1, b1, w2, b2, w3, b3, *, block_m, single_buffer_weights):
    M, embed = x.shape
    h1 = w1.shape[1]
    h2 = w2.shape[1]
    out = w3.shape[1]

    cdt = jnp.bfloat16  # MXU-native compute dtype

    # Lane-pad every feature dim to a multiple of 128 (lane-dense loads/stores,
    # clean (8,128) tiling).  Zero padding is semantics-preserving here.
    E = _round_up(embed, 128)
    H1 = _round_up(h1, 128)
    H2 = _round_up(h2, 128)
    O = _round_up(out, 128)

    # Row tile: don't over-tile tiny batches (16 = bf16 sublane packing).
    bm = min(block_m, _round_up(M, 16))
    Mp = _round_up(M, bm)

    def pad2(a, r, c):
        return jnp.pad(a, ((0, r - a.shape[0]), (0, c - a.shape[1])))

    x_p = pad2(x, Mp, E).astype(cdt)
    w1_p = pad2(w1, E, H1).astype(cdt)
    w2_p = pad2(w2, H1, H2).astype(cdt)
    w3_p = pad2(w3, H2, O).astype(cdt)
    b1_p = pad2(b1.reshape(1, -1), 1, H1).astype(jnp.float32)
    b2_p = pad2(b2.reshape(1, -1), 1, H2).astype(jnp.float32)
    b3_p = pad2(b3.reshape(1, -1), 1, O).astype(jnp.float32)

    grid = (Mp // bm,)

    def _row_spec(shape):
        return pl.BlockSpec(shape, lambda i: (i, 0))

    const_kw = {"pipeline_mode": pl.Buffered(1)} if single_buffer_weights else {}

    def _const_spec(shape):
        # Constant block index across the grid -> one VMEM buffer is enough.
        return pl.BlockSpec(shape, lambda i: (0, 0), **const_kw)

    # VMEM budget: x/out tiles double-buffered, weights+biases resident,
    # plus the f32 fused intermediates; headroom; clamp to v7x's 64 MiB.
    bytes_needed = (
        2 * bm * E * 2                      # x tile (bf16, double-buffered)
        + (E * H1 + H1 * H2 + H2 * O) * 2   # weights (bf16)
        + (H1 + H2 + O) * 4                 # biases (f32)
        + 2 * bm * O * 4                    # out tile (f32, double-buffered)
        + bm * (H1 + H2) * 4                # fused f32 intermediates
    )
    vmem_limit = min(max(int(1.5 * bytes_needed) + (4 << 20), 16 << 20), 64 << 20)

    y_p = pl.pallas_call(
        _mlp_kernel,
        out_shape=jax.ShapeDtypeStruct((Mp, O), x.dtype),
        grid_spec=pltpu.PrefetchScalarGridSpec(
            num_scalar_prefetch=0,
            grid=grid,
            in_specs=[
                _row_spec((bm, E)),       # x row tile
                _const_spec((E, H1)),     # W1 (full, resident)
                _const_spec((1, H1)),     # b1
                _const_spec((H1, H2)),    # W2
                _const_spec((1, H2)),     # b2
                _const_spec((H2, O)),     # W3
                _const_spec((1, O)),      # b3
            ],
            out_specs=_row_spec((bm, O)),
        ),
        compiler_params=pltpu.CompilerParams(
            dimension_semantics=("parallel",),  # shard M tiles across TCs (v7x)
            vmem_limit_bytes=vmem_limit,
        ),
    )(x_p, w1_p, b1_p, w2_p, b2_p, w3_p, b3_p)

    return y_p[:M, :out]


def mlp_forward(x, w1, b1, w2, b2, w3, b3, *, block_m=128):
    """x: (M, embed) float32. Returns (M, out) float32."""
    args = (x, w1, b1, w2, b2, w3, b3)
    try:
        return _mlp_forward_impl(*args, block_m=block_m, single_buffer_weights=True)
    except Exception:
        # Fallback for jax versions that reject pl.Buffered(1) on a pallas_call
        # BlockSpec; identical kernel with default double-buffered weights.
        return _mlp_forward_impl(*args, block_m=block_m, single_buffer_weights=False)


def init_mlp_params(key, embed, out):
    """Deterministic init mimicking torch nn.Linear default U(-1/sqrt(fan_in), +1/sqrt(fan_in))."""
    dims = [(embed, embed * 3), (embed * 3, embed * 9), (embed * 9, out)]
    params = []
    for fan_in, fan_out in dims:
        key, kw, kb = jax.random.split(key, 3)
        bound = 1.0 / jnp.sqrt(fan_in)
        # stored as (in_features, out_features) so the kernel does x @ W
        w = jax.random.uniform(kw, (fan_in, fan_out), jnp.float32, -bound, bound)
        b = jax.random.uniform(kb, (fan_out,), jnp.float32, -bound, bound)
        params.extend([w, b])
    return params


def mlp_reference(x, w1, b1, w2, b2, w3, b3, cast=None):
    """Pure-JAX reference. cast=jnp.bfloat16 reproduces the kernel's cast points."""
    if cast is not None:
        x, w1, w2, w3 = (a.astype(cast) for a in (x, w1, w2, w3))
    h = jnp.maximum(jnp.dot(x, w1, preferred_element_type=jnp.float32) + b1, 0.0)
    if cast is not None:
        h = h.astype(cast)
    h = jnp.maximum(jnp.dot(h, w2, preferred_element_type=jnp.float32) + b2, 0.0)
    if cast is not None:
        h = h.astype(cast)
    return jnp.dot(h, w3, preferred_element_type=jnp.float32) + b3


if __name__ == "__main__":
    batch, embed, out = 8, 32, 16

    key = jax.random.PRNGKey(0)
    key, kx = jax.random.split(key)
    x = jax.random.normal(kx, (batch, embed), jnp.float32)

    w1, b1, w2, b2, w3, b3 = init_mlp_params(key, embed, out)

    y = mlp_forward(x, w1, b1, w2, b2, w3, b3)
    y = jax.block_until_ready(y)
    assert y.shape == (batch, out)
    assert y.dtype == jnp.float32

    # Tight check vs. a bf16-consistent reference (same cast points as kernel).
    y_bf16_ref = mlp_reference(x, w1, b1, w2, b2, w3, b3, cast=jnp.bfloat16)
    assert jnp.allclose(y, y_bf16_ref, atol=2e-3, rtol=2e-3)

    # Loose check vs. the pure-f32 reference (torch-module semantics).
    y_f32_ref = mlp_reference(x, w1, b1, w2, b2, w3, b3)
    assert jnp.allclose(y, y_f32_ref, atol=5e-2, rtol=5e-2)

    print("KERNEL_OK")
</pallas_src>

<mosaic_0001>
module attributes {stable_mosaic.version = 11 : i64} {
  func.func @_mlp_kernel(%arg0: i32, %arg1: memref<16x128xbf16, #tpu.memory_space<vmem>>, %arg2: memref<128x128xbf16, #tpu.memory_space<vmem>>, %arg3: memref<1x128xf32, #tpu.memory_space<vmem>>, %arg4: memref<128x384xbf16, #tpu.memory_space<vmem>>, %arg5: memref<1x384xf32, #tpu.memory_space<vmem>>, %arg6: memref<384x128xbf16, #tpu.memory_space<vmem>>, %arg7: memref<1x128xf32, #tpu.memory_space<vmem>>, %arg8: memref<16x128xf32, #tpu.memory_space<vmem>>) attributes {dimension_semantics = [#tpu.dimension_semantics<parallel>], iteration_bounds = array<i64: 1>, scalar_prefetch = 0 : i64, scratch_operands = 0 : i64, tpu.core_type = #tpu.core_type<tc>, window_params = [{transform_indices = @transform_0, window_bounds = array<i64: 16, 128>}, {pipeline_mode = #tpu.pipeline_mode<synchronous>, transform_indices = @transform_1, window_bounds = array<i64: 128, 128>}, {pipeline_mode = #tpu.pipeline_mode<synchronous>, transform_indices = @transform_2, window_bounds = array<i64: 1, 128>}, {pipeline_mode = #tpu.pipeline_mode<synchronous>, transform_indices = @transform_3, window_bounds = array<i64: 128, 384>}, {pipeline_mode = #tpu.pipeline_mode<synchronous>, transform_indices = @transform_4, window_bounds = array<i64: 1, 384>}, {pipeline_mode = #tpu.pipeline_mode<synchronous>, transform_indices = @transform_5, window_bounds = array<i64: 384, 128>}, {pipeline_mode = #tpu.pipeline_mode<synchronous>, transform_indices = @transform_6, window_bounds = array<i64: 1, 128>}, {transform_indices = @transform_7, window_bounds = array<i64: 16, 128>}]} {
    %c0 = arith.constant 0 : index
    %c0_0 = arith.constant 0 : index
    %0 = vector.load %arg1[%c0, %c0_0] : memref<16x128xbf16, #tpu.memory_space<vmem>>, vector<16x128xbf16>
    %c0_1 = arith.constant 0 : index
    %c0_2 = arith.constant 0 : index
    %1 = vector.load %arg2[%c0_1, %c0_2] : memref<128x128xbf16, #tpu.memory_space<vmem>>, vector<128x128xbf16>
    %cst = arith.constant dense<0.000000e+00> : vector<16x128xf32>
    %2 = tpu.matmul %0, %1, %cst {dimension_numbers = #tpu.dot_dimension_numbers<[1], [0], [0], [1], [0, 0, 1, 1], [], []>} : vector<16x128xbf16>, vector<128x128xbf16>, vector<16x128xf32> -> vector<16x128xf32>
    %c0_3 = arith.constant 0 : index
    %c0_4 = arith.constant 0 : index
    %3 = vector.load %arg3[%c0_3, %c0_4] : memref<1x128xf32, #tpu.memory_space<vmem>>, vector<1x128xf32>
    %4 = vector.broadcast %3 : vector<1x128xf32> to vector<16x128xf32>
    %5 = arith.addf %2, %4 : vector<16x128xf32>
    %cst_5 = arith.constant 0.000000e+00 : f32
    %6 = vector.broadcast %cst_5 : f32 to vector<16x128xf32>
    %7 = arith.maximumf %5, %6 : vector<16x128xf32>
    %8 = arith.truncf %7 : vector<16x128xf32> to vector<16x128xbf16>
    %c0_6 = arith.constant 0 : index
    %c0_7 = arith.constant 0 : index
    %9 = vector.load %arg4[%c0_6, %c0_7] : memref<128x384xbf16, #tpu.memory_space<vmem>>, vector<128x384xbf16>
    %cst_8 = arith.constant dense<0.000000e+00> : vector<16x384xf32>
    %10 = tpu.matmul %8, %9, %cst_8 {dimension_numbers = #tpu.dot_dimension_numbers<[1], [0], [0], [1], [0, 0, 1, 1], [], []>} : vector<16x128xbf16>, vector<128x384xbf16>, vector<16x384xf32> -> vector<16x384xf32>
    %c0_9 = arith.constant 0 : index
    %c0_10 = arith.constant 0 : index
    %11 = vector.load %arg5[%c0_9, %c0_10] : memref<1x384xf32, #tpu.memory_space<vmem>>, vector<1x384xf32>
    %12 = vector.broadcast %11 : vector<1x384xf32> to vector<16x384xf32>
    %13 = arith.addf %10, %12 : vector<16x384xf32>
    %cst_11 = arith.constant 0.000000e+00 : f32
    %14 = vector.broadcast %cst_11 : f32 to vector<16x384xf32>
    %15 = arith.maximumf %13, %14 : vector<16x384xf32>
    %16 = arith.truncf %15 : vector<16x384xf32> to vector<16x384xbf16>
    %c0_12 = arith.constant 0 : index
    %c0_13 = arith.constant 0 : index
    %17 = vector.load %arg6[%c0_12, %c0_13] : memref<384x128xbf16, #tpu.memory_space<vmem>>, vector<384x128xbf16>
    %cst_14 = arith.constant dense<0.000000e+00> : vector<16x128xf32>
    %18 = tpu.matmul %16, %17, %cst_14 {dimension_numbers = #tpu.dot_dimension_numbers<[1], [0], [0], [1], [0, 0, 1, 1], [], []>} : vector<16x384xbf16>, vector<384x128xbf16>, vector<16x128xf32> -> vector<16x128xf32>
    %c0_15 = arith.constant 0 : index
    %c0_16 = arith.constant 0 : index
    %19 = vector.load %arg7[%c0_15, %c0_16] : memref<1x128xf32, #tpu.memory_space<vmem>>, vector<1x128xf32>
    %20 = vector.broadcast %19 : vector<1x128xf32> to vector<16x128xf32>
    %21 = arith.addf %18, %20 : vector<16x128xf32>
    %c0_17 = arith.constant 0 : index
    %c0_18 = arith.constant 0 : index
    %22 = vector.load %arg8[%c0_17, %c0_18] : memref<16x128xf32, #tpu.memory_space<vmem>>, vector<16x128xf32>
    tpu.vector_store %arg8[%c0_17, %c0_18], %21 {strides = array<i32>} : memref<16x128xf32, #tpu.memory_space<vmem>>, vector<16x128xf32>,
    return
  }
  func.func @transform_0(%arg0: i32) -> (i32, i32) {
    %c0_i32 = arith.constant 0 : i32
    %c0_i32_0 = arith.constant 0 : i32
    return %arg0, %c0_i32 : i32, i32
  }
  func.func @transform_1(%arg0: i32) -> (i32, i32) {
    %c0_i32 = arith.constant 0 : i32
    %c0_i32_0 = arith.constant 0 : i32
    %c0_i32_1 = arith.constant 0 : i32
    return %c0_i32, %c0_i32_0 : i32, i32
  }
  func.func @transform_2(%arg0: i32) -> (i32, i32) {
    %c0_i32 = arith.constant 0 : i32
    %c0_i32_0 = arith.constant 0 : i32
    %c0_i32_1 = arith.constant 0 : i32
    return %c0_i32, %c0_i32_0 : i32, i32
  }
  func.func @transform_3(%arg0: i32) -> (i32, i32) {
    %c0_i32 = arith.constant 0 : i32
    %c0_i32_0 = arith.constant 0 : i32
    %c0_i32_1 = arith.constant 0 : i32
    return %c0_i32, %c0_i32_0 : i32, i32
  }
  func.func @transform_4(%arg0: i32) -> (i32, i32) {
    %c0_i32 = arith.constant 0 : i32
    %c0_i32_0 = arith.constant 0 : i32
    %c0_i32_1 = arith.constant 0 : i32
    return %c0_i32, %c0_i32_0 : i32, i32
  }
  func.func @transform_5(%arg0: i32) -> (i32, i32) {
    %c0_i32 = arith.constant 0 : i32
    %c0_i32_0 = arith.constant 0 : i32
    %c0_i32_1 = arith.constant 0 : i32
    return %c0_i32, %c0_i32_0 : i32, i32
  }
  func.func @transform_6(%arg0: i32) -> (i32, i32) {
    %c0_i32 = arith.constant 0 : i32
    %c0_i32_0 = arith.constant 0 : i32
    %c0_i32_1 = arith.constant 0 : i32
    return %c0_i32, %c0_i32_0 : i32, i32
  }
  func.func @transform_7(%arg0: i32) -> (i32, i32) {
    %c0_i32 = arith.constant 0 : i32
    %c0_i32_0 = arith.constant 0 : i32
    return %arg0, %c0_i32 : i32, i32
  }
}

module attributes {stable_mosaic.version = 11 : i64} {
  func.func @_mlp_kernel(%arg0: i32, %arg1: memref<16x128xbf16, #tpu.memory_space<vmem>>, %arg2: memref<128x128xbf16, #tpu.memory_space<vmem>>, %arg3: memref<1x128xf32, #tpu.memory_space<vmem>>, %arg4: memref<128x384xbf16, #tpu.memory_space<vmem>>, %arg5: memref<1x384xf32, #tpu.memory_space<vmem>>, %arg6: memref<384x128xbf16, #tpu.memory_space<vmem>>, %arg7: memref<1x128xf32, #tpu.memory_space<vmem>>, %arg8: memref<16x128xf32, #tpu.memory_space<vmem>>) attributes {dimension_semantics = [#tpu.dimension_semantics<parallel>], iteration_bounds = array<i64: 1>, scalar_prefetch = 0 : i64, scratch_operands = 0 : i64, tpu.core_type = #tpu.core_type<tc>, window_params = [{transform_indices = @transform_0, window_bounds = array<i64: 16, 128>}, {pipeline_mode = #tpu.pipeline_mode<synchronous>, transform_indices = @transform_1, window_bounds = array<i64: 128, 128>}, {pipeline_mode = #tpu.pipeline_mode<synchronous>, transform_indices = @transform_2, window_bounds = array<i64: 1, 128>}, {pipeline_mode = #tpu.pipeline_mode<synchronous>, transform_indices = @transform_3, window_bounds = array<i64: 128, 384>}, {pipeline_mode = #tpu.pipeline_mode<synchronous>, transform_indices = @transform_4, window_bounds = array<i64: 1, 384>}, {pipeline_mode = #tpu.pipeline_mode<synchronous>, transform_indices = @transform_5, window_bounds = array<i64: 384, 128>}, {pipeline_mode = #tpu.pipeline_mode<synchronous>, transform_indices = @transform_6, window_bounds = array<i64: 1, 128>}, {transform_indices = @transform_7, window_bounds = array<i64: 16, 128>}]} {
    %c0 = arith.constant 0 : index
    %c0_0 = arith.constant 0 : index
    %0 = vector.load %arg1[%c0, %c0_0] : memref<16x128xbf16, #tpu.memory_space<vmem>>, vector<16x128xbf16>
    %c0_1 = arith.constant 0 : index
    %c0_2 = arith.constant 0 : index
    %1 = vector.load %arg2[%c0_1, %c0_2] : memref<128x128xbf16, #tpu.memory_space<vmem>>, vector<128x128xbf16>
    %cst = arith.constant dense<0.000000e+00> : vector<16x128xf32>
    %2 = tpu.matmul %0, %1, %cst {dimension_numbers = #tpu.dot_dimension_numbers<[1], [0], [0], [1], [0, 0, 1, 1], [], []>} : vector<16x128xbf16>, vector<128x128xbf16>, vector<16x128xf32> -> vector<16x128xf32>
    %c0_3 = arith.constant 0 : index
    %c0_4 = arith.constant 0 : index
    %3 = vector.load %arg3[%c0_3, %c0_4] : memref<1x128xf32, #tpu.memory_space<vmem>>, vector<1x128xf32>
    %4 = vector.broadcast %3 : vector<1x128xf32> to vector<16x128xf32>
    %5 = arith.addf %2, %4 : vector<16x128xf32>
    %cst_5 = arith.constant 0.000000e+00 : f32
    %6 = vector.broadcast %cst_5 : f32 to vector<16x128xf32>
    %7 = arith.maximumf %5, %6 : vector<16x128xf32>
    %8 = arith.truncf %7 : vector<16x128xf32> to vector<16x128xbf16>
    %c0_6 = arith.constant 0 : index
    %c0_7 = arith.constant 0 : index
    %9 = vector.load %arg4[%c0_6, %c0_7] : memref<128x384xbf16, #tpu.memory_space<vmem>>, vector<128x384xbf16>
    %cst_8 = arith.constant dense<0.000000e+00> : vector<16x384xf32>
    %10 = tpu.matmul %8, %9, %cst_8 {dimension_numbers = #tpu.dot_dimension_numbers<[1], [0], [0], [1], [0, 0, 1, 1], [], []>} : vector<16x128xbf16>, vector<128x384xbf16>, vector<16x384xf32> -> vector<16x384xf32>
    %c0_9 = arith.constant 0 : index
    %c0_10 = arith.constant 0 : index
    %11 = vector.load %arg5[%c0_9, %c0_10] : memref<1x384xf32, #tpu.memory_space<vmem>>, vector<1x384xf32>
    %12 = vector.broadcast %11 : vector<1x384xf32> to vector<16x384xf32>
    %13 = arith.addf %10, %12 : vector<16x384xf32>
    %cst_11 = arith.constant 0.000000e+00 : f32
    %14 = vector.broadcast %cst_11 : f32 to vector<16x384xf32>
    %15 = arith.maximumf %13, %14 : vector<16x384xf32>
    %16 = arith.truncf %15 : vector<16x384xf32> to vector<16x384xbf16>
    %c0_12 = arith.constant 0 : index
    %c0_13 = arith.constant 0 : index
    %17 = vector.load %arg6[%c0_12, %c0_13] : memref<384x128xbf16, #tpu.memory_space<vmem>>, vector<384x128xbf16>
    %cst_14 = arith.constant dense<0.000000e+00> : vector<16x128xf32>
    %18 = tpu.matmul %16, %17, %cst_14 {dimension_numbers = #tpu.dot_dimension_numbers<[1], [0], [0], [1], [0, 0, 1, 1], [], []>} : vector<16x384xbf16>, vector<384x128xbf16>, vector<16x128xf32> -> vector<16x128xf32>
    %c0_15 = arith.constant 0 : index
    %c0_16 = arith.constant 0 : index
    %19 = vector.load %arg7[%c0_15, %c0_16] : memref<1x128xf32, #tpu.memory_space<vmem>>, vector<1x128xf32>
    %20 = vector.broadcast %19 : vector<1x128xf32> to vector<16x128xf32>
    %21 = arith.addf %18, %20 : vector<16x128xf32>
    %c0_17 = arith.constant 0 : index
    %c0_18 = arith.constant 0 : index
    %22 = vector.load %arg8[%c0_17, %c0_18] : memref<16x128xf32, #tpu.memory_space<vmem>>, vector<16x128xf32>
    tpu.vector_store %arg8[%c0_17, %c0_18], %21 {strides = array<i32>} : memref<16x128xf32, #tpu.memory_space<vmem>>, vector<16x128xf32>,
    return
  }
  func.func @transform_0(%arg0: i32) -> (i32, i32) {
    %c0_i32 = arith.constant 0 : i32
    %c0_i32_0 = arith.constant 0 : i32
    return %arg0, %c0_i32 : i32, i32
  }
  func.func @transform_1(%arg0: i32) -> (i32, i32) {
    %c0_i32 = arith.constant 0 : i32
    %c0_i32_0 = arith.constant 0 : i32
    %c0_i32_1 = arith.constant 0 : i32
    return %c0_i32, %c0_i32_0 : i32, i32
  }
  func.func @transform_2(%arg0: i32) -> (i32, i32) {
    %c0_i32 = arith.constant 0 : i32
    %c0_i32_0 = arith.constant 0 : i32
    %c0_i32_1 = arith.constant 0 : i32
    return %c0_i32, %c0_i32_0 : i32, i32
  }
  func.func @transform_3(%arg0: i32) -> (i32, i32) {
    %c0_i32 = arith.constant 0 : i32
    %c0_i32_0 = arith.constant 0 : i32
    %c0_i32_1 = arith.constant 0 : i32
    return %c0_i32, %c0_i32_0 : i32, i32
  }
  func.func @transform_4(%arg0: i32) -> (i32, i32) {
    %c0_i32 = arith.constant 0 : i32
    %c0_i32_0 = arith.constant 0 : i32
    %c0_i32_1 = arith.constant 0 : i32
    return %c0_i32, %c0_i32_0 : i32, i32
  }
  func.func @transform_5(%arg0: i32) -> (i32, i32) {
    %c0_i32 = arith.constant 0 : i32
    %c0_i32_0 = arith.constant 0 : i32
    %c0_i32_1 = arith.constant 0 : i32
    return %c0_i32, %c0_i32_0 : i32, i32
  }
  func.func @transform_6(%arg0: i32) -> (i32, i32) {
    %c0_i32 = arith.constant 0 : i32
    %c0_i32_0 = arith.constant 0 : i32
    %c0_i32_1 = arith.constant 0 : i32
    return %c0_i32, %c0_i32_0 : i32, i32
  }
  func.func @transform_7(%arg0: i32) -> (i32, i32) {
    %c0_i32 = arith.constant 0 : i32
    %c0_i32_0 = arith.constant 0 : i32
    return %arg0, %c0_i32 : i32, i32
  }
}

</mosaic_0001>

<bundles_post_ra>
// kernel: _mlp_forward_impl.1
= control target key start
LH: loop header
LB: loop body
LE: loop exit
PB: predicated region body
PF: predicated region fallthrough
CT: control target
= control target key end

     0   :  { %s1167_s1 = inlined_call_operand.vmem [shape: bf16[128,128], index: 1, kind: input, shape index: {}]   ;;  %s1168_s3 = inlined_call_operand.vmem [shape: bf16[128,384], index: 3, kind: input, shape index: {}]   ;;  %s1169_s2 = inlined_call_operand.vmem [shape: f32[1,128], index: 2, kind: input, shape index: {}]   ;;  %s1170_s0 = inlined_call_operand.vmem [shape: bf16[16,128], index: 0, kind: input, shape index: {}]   ;;  %s1171_s5 = inlined_call_operand.vmem [shape: bf16[384,128], index: 5, kind: input, shape index: {}]   ;;  %s1172_s6 = inlined_call_operand.vmem [shape: f32[1,128], index: 6, kind: input, shape index: {}]   ;;  %s1173_s4 = inlined_call_operand.vmem [shape: f32[1,384], index: 4, kind: input, shape index: {}]   ;;  %s1174_s7 = inlined_call_operand.vmem [shape: f32[16,128], index: 7, kind: output, shape index: {}]  }
   0x1   :  { %v818_v0 = vld [vmem:[%s1167_s1 + $0x38] sm:$0xff]  ;;  %v817_v1 = vld [vmem:[%s1167_s1 + $0x30] sm:$0xff]  ;;  %v704_v2 = vld [vmem:[%s1168_s3 + $0xa8] sm:$0xf] }
   0x2   :  { %102 = vmatpush.bf16.msra.mxu0 %v818_v0  ;;  %v841_v3 = vld [vmem:[%s1168_s3 + $0xb0] sm:$0xf0]  ;;  %v840_v4 = vld [vmem:[%s1168_s3 + $0xac] sm:$0xf]  ;;  %v706_v7 = vld [vmem:[%s1168_s3 + $0xb4] sm:$0xf0] }
   0x3   :  { %v816_v5 = vld [vmem:[%s1167_s1 + $0x28] sm:$0xff]  ;;  %v705_v6 = vor.u32 %v841_v3, %v704_v2  ;;  %v712_v8 = vld [vmem:[%s1168_s3 + $0xb0] sm:$0xf]  ;;  %v842_v9 = vld [vmem:[%s1168_s3 + $0xb8] sm:$0xf0]  ;;  %v709_v10 = vor.u32 %v840_v4, %v706_v7 }
   0x4   :  { %v713_v11 = vor.u32 %v842_v9, %v712_v8  ;;  %v692_v12 = vld [vmem:[%s1168_s3 + $0x90] sm:$0xf]  ;;  %v838_v13 = vld [vmem:[%s1168_s3 + $0x98] sm:$0xf0]  ;;  %v837_v14 = vld [vmem:[%s1168_s3 + $0x94] sm:$0xf] }
   0x5   :  { %287 = vmatpush.bf16.msra.mxu1 %v705_v6  ;;  %v693_v15 = vor.u32 %v838_v13, %v692_v12  ;;  %v694_v16 = vld [vmem:[%s1168_s3 + $0x9c] sm:$0xf0]  ;;  %v700_v17 = vld [vmem:[%s1168_s3 + $0x98] sm:$0xf]  ;;  %v839_v18 = vld [vmem:[%s1168_s3 + $0xa0] sm:$0xf0]  ;;  %301 = vmatpush.bf16.msra.mxu2 %v709_v10 }
   0x6   :  { %103 = vmatpush.bf16.msra.mxu0 %v817_v1  ;;  %315 = vmatpush.bf16.msra.mxu3 %v713_v11  ;;  %v697_v19 = vor.u32 %v837_v14, %v694_v16  ;;  %v701_v20 = vor.u32 %v839_v18, %v700_v17  ;;  %v680_v21 = vld [vmem:[%s1168_s3 + $0x78] sm:$0xf]  ;;  %v835_v22 = vld [vmem:[%s1168_s3 + $0x80] sm:$0xf0]  ;;  %v834_v23 = vld [vmem:[%s1168_s3 + $0x7c] sm:$0xf] }
   0x7   :  { %v682_v24 = vld [vmem:[%s1168_s3 + $0x84] sm:$0xf0]  ;;  %v688_v25 = vld [vmem:[%s1168_s3 + $0x80] sm:$0xf]  ;;  %v836_v26 = vld [vmem:[%s1168_s3 + $0x88] sm:$0xf0]  ;;  %v681_v28 = vor.u32 %v835_v22, %v680_v21 }
   0x8   :  { %v815_v27 = vld [vmem:[%s1167_s1 + $0x20] sm:$0xff]  ;;  %v685_v30 = vor.u32 %v834_v23, %v682_v24  ;;  %v689_v31 = vor.u32 %v836_v26, %v688_v25  ;;  %v832_v32 = vld [vmem:[%s1168_s3 + $0x68] sm:$0xf0]  ;;  %v670_v34 = vld [vmem:[%s1168_s3 + $0x6c] sm:$0xf0] }
   0x9   :  { %288 = vmatpush.bf16.msra.mxu1 %v693_v15  ;;  %v668_v29 = vld [vmem:[%s1168_s3 + $0x60] sm:$0xf]  ;;  %302 = vmatpush.bf16.msra.mxu2 %v697_v19  ;;  %v831_v33 = vld [vmem:[%s1168_s3 + $0x64] sm:$0xf]  ;;  %v676_v35 = vld [vmem:[%s1168_s3 + $0x68] sm:$0xf] }
   0xa   :  { %104 = vmatpush.bf16.msra.mxu0 %v816_v5  ;;  %316 = vmatpush.bf16.msra.mxu3 %v701_v20  ;;  %v833_v36 = vld [vmem:[%s1168_s3 + $0x70] sm:$0xf0]  ;;  %v814_v37 = vld [vmem:[%s1167_s1 + $0x18] sm:$0xff]  ;;  %v669_v38 = vor.u32 %v832_v32, %v668_v29  ;;  %v673_v39 = vor.u32 %v831_v33, %v670_v34  ;;  %v812_v42 = vld [vmem:[%s1167_s1 + $0x8] sm:$0xff] }
   0xb   :  { %v677_v40 = vor.u32 %v833_v36, %v676_v35  ;;  %v813_v41 = vld [vmem:[%s1167_s1 + $0x10] sm:$0xff]  ;;  %v811_v43 = vld [vmem:[%s1167_s1] sm:$0xff]  ;;  %v656_v45 = vld [vmem:[%s1168_s3 + $0x48] sm:$0xf] }
   0xc   :  { %v810_v44 = vld [vmem:[%s1170_s0] sm:$0xff]  ;;  %v829_v46 = vld [vmem:[%s1168_s3 + $0x50] sm:$0xf0]  ;;  %v828_v47 = vld [vmem:[%s1168_s3 + $0x4c] sm:$0xf] }
   0xd   :  { %289 = vmatpush.bf16.msra.mxu1 %v681_v28  ;;  %303 = vmatpush.bf16.msra.mxu2 %v685_v30  ;;  %v657_v48 = vor.u32 %v829_v46, %v656_v45  ;;  %v658_v49 = vld [vmem:[%s1168_s3 + $0x54] sm:$0xf0]  ;;  %v664_v50 = vld [vmem:[%s1168_s3 + $0x50] sm:$0xf]  ;;  %v830_v51 = vld [vmem:[%s1168_s3 + $0x58] sm:$0xf0] }
   0xe   :  { %105 = vmatpush.bf16.msra.mxu0 %v815_v27  ;;  %317 = vmatpush.bf16.msra.mxu3 %v689_v31  ;;  %v661_v52 = vor.u32 %v828_v47, %v658_v49  ;;  %v665_v53 = vor.u32 %v830_v51, %v664_v50  ;;  %v644_v54 = vld [vmem:[%s1168_s3 + $0x30] sm:$0xf]  ;;  %v826_v55 = vld [vmem:[%s1168_s3 + $0x38] sm:$0xf0]  ;;  %v825_v56 = vld [vmem:[%s1168_s3 + $0x34] sm:$0xf] }
   0xf   :  { %v645_v57 = vor.u32 %v826_v55, %v644_v54  ;;  %v646_v58 = vld [vmem:[%s1168_s3 + $0x3c] sm:$0xf0]  ;;  %v652_v59 = vld [vmem:[%s1168_s3 + $0x38] sm:$0xf]  ;;  %v827_v60 = vld [vmem:[%s1168_s3 + $0x40] sm:$0xf0] }
  0x10   :  { %v649_v61 = vor.u32 %v825_v56, %v646_v58  ;;  %v653_v62 = vor.u32 %v827_v60, %v652_v59  ;;  %v632_v63 = vld [vmem:[%s1168_s3 + $0x18] sm:$0xf]  ;;  %v823_v0 = vld [vmem:[%s1168_s3 + $0x20] sm:$0xf0]  ;;  %v822_v1 = vld [vmem:[%s1168_s3 + $0x1c] sm:$0xf] }
  0x11   :  { %290 = vmatpush.bf16.msra.mxu1 %v669_v38  ;;  %304 = vmatpush.bf16.msra.mxu2 %v673_v39  ;;  %v633_v2 = vor.u32 %v823_v0, %v632_v63  ;;  %v634_v3 = vld [vmem:[%s1168_s3 + $0x24] sm:$0xf0]  ;;  %v640_v4 = vld [vmem:[%s1168_s3 + $0x20] sm:$0xf]  ;;  %v824_v5 = vld [vmem:[%s1168_s3 + $0x28] sm:$0xf0] }
  0x12   :  { %106 = vmatpush.bf16.msra.mxu0 %v814_v37  ;;  %318 = vmatpush.bf16.msra.mxu3 %v677_v40  ;;  %v637_v6 = vor.u32 %v822_v1, %v634_v3  ;;  %v641_v7 = vor.u32 %v824_v5, %v640_v4  ;;  %v620_v8 = vld [vmem:[%s1168_s3] sm:$0xf]  ;;  %v820_v9 = vld [vmem:[%s1168_s3 + $0x8] sm:$0xf0]  ;;  %v819_v10 = vld [vmem:[%s1168_s3 + $0x4] sm:$0xf] }
  0x13   :  { %v621_v11 = vor.u32 %v820_v9, %v620_v8  ;;  %v622_v12 = vld [vmem:[%s1168_s3 + $0xc] sm:$0xf0]  ;;  %v628_v13 = vld [vmem:[%s1168_s3 + $0x8] sm:$0xf]  ;;  %v821_v14 = vld [vmem:[%s1168_s3 + $0x10] sm:$0xf0] }
  0x14   :  { %v625_v15 = vor.u32 %v819_v10, %v622_v12  ;;  %v629_v16 = vor.u32 %v821_v14, %v628_v13  ;;  %v850_v17 = vld [vmem:[%s1171_s5 + $0x38] sm:$0xff]  ;;  %v849_v20 = vld [vmem:[%s1171_s5 + $0x30] sm:$0xff]  ;;  %v848_v23 = vld [vmem:[%s1171_s5 + $0x28] sm:$0xff] }
  0x15   :  { %291 = vmatpush.bf16.msra.mxu1 %v657_v48  ;;  %305 = vmatpush.bf16.msra.mxu2 %v661_v52  ;;  %v858_v18 = vld [vmem:[%s1171_s5 + $0x78] sm:$0xff]  ;;  %v857_v21 = vld [vmem:[%s1171_s5 + $0x70] sm:$0xff]  ;;  %v856_v24 = vld [vmem:[%s1171_s5 + $0x68] sm:$0xff] }
  0x16   :  { %107 = vmatpush.bf16.msra.mxu0 %v813_v41  ;;  %319 = vmatpush.bf16.msra.mxu3 %v665_v53  ;;  %v866_v19 = vld [vmem:[%s1171_s5 + $0xb8] sm:$0xff]  ;;  %v865_v22 = vld [vmem:[%s1171_s5 + $0xb0] sm:$0xff]  ;;  %v864_v25 = vld [vmem:[%s1171_s5 + $0xa8] sm:$0xff] }
  0x17   :  { %v847_v26 = vld [vmem:[%s1171_s5 + $0x20] sm:$0xff]  ;;  %v846_v35 = vld [vmem:[%s1171_s5 + $0x18] sm:$0xff]  ;;  %v845_v38 = vld [vmem:[%s1171_s5 + $0x10] sm:$0xff] }
  0x18   :  { %v867_v28 = vld [vmem:[%s1169_s2] ss:$0 sm:$0xff]  ;;  %v854_v39 = vld [vmem:[%s1171_s5 + $0x58] sm:$0xff]  ;;  %v844_v41 = vld [vmem:[%s1171_s5 + $0x8] sm:$0xff] }
  0x19   :  { %292 = vmatpush.bf16.msra.mxu1 %v645_v57  ;;  %306 = vmatpush.bf16.msra.mxu2 %v649_v61  ;;  %v855_v36 = vld [vmem:[%s1171_s5 + $0x60] sm:$0xff]  ;;  %v862_v40 = vld [vmem:[%s1171_s5 + $0x98] sm:$0xff]  ;;  %v852_v45 = vld [vmem:[%s1171_s5 + $0x48] sm:$0xff] }
  0x1a   :  { %108 = vmatpush.bf16.msra.mxu0 %v812_v42  ;;  %320 = vmatpush.bf16.msra.mxu3 %v653_v62  ;;  %v863_v37 = vld [vmem:[%s1171_s5 + $0xa0] sm:$0xff]  ;;  %v853_v42 = vld [vmem:[%s1171_s5 + $0x50] sm:$0xff]  ;;  %v860_v46 = vld [vmem:[%s1171_s5 + $0x88] sm:$0xff] }
  0x1b   :  { %v851_v47 = vld [vmem:[%s1171_s5 + $0x40] sm:$0xff] }
  0x1c   :  { %v859_v48 = vld [vmem:[%s1171_s5 + $0x80] sm:$0xff] }
  0x1d   :  { %293 = vmatpush.bf16.msra.mxu1 %v633_v2  ;;  %307 = vmatpush.bf16.msra.mxu2 %v637_v6  ;;  %v151_v49 = vld [vmem:[%s1173_s4] sm:$0x7] }
  0x1e   :  { %109 = vmatpush.bf16.msra.mxu0 %v811_v43  ;;  %321 = vmatpush.bf16.msra.mxu3 %v641_v7  ;;  %v861_v43 = vld [vmem:[%s1171_s5 + $0x90] sm:$0xff]  ;;  %v153_v51 = vperm.slane %v151_v49, 0  ;;  %v154_v56 = vperm.slane %v151_v49, 1  ;;  %v155_v58 = vperm.slane %v151_v49, 2 }
  0x21   :  { %110 = vmatmul.bf16.vlgmr.msra.gmra.mxu0 %v810_v44  ;;  %294 = vmatpush.bf16.msra.mxu1 %v621_v11  ;;  %v843_v44 = vld [vmem:[%s1171_s5] sm:$0xff] }
  0x22   :  { %308 = vmatpush.bf16.msra.mxu2 %v625_v15  ;;  %322 = vmatpush.bf16.msra.mxu3 %v629_v16  ;;  %v868_v11 = vld [vmem:[%s1172_s6] ss:$0 sm:$0xff] }
  0x23   :  { %534 = vmatpush.bf16.msrb.mxu0 %v850_v17 }
  0x25   :  { %548 = vmatpush.bf16.msrb.mxu1 %v858_v18 }
  0x26   :  { %562 = vmatpush.bf16.msrb.mxu2 %v866_v19 }
  0x27   :  { %535 = vmatpush.bf16.msrb.mxu0 %v849_v20 }
  0x29   :  { %549 = vmatpush.bf16.msrb.mxu1 %v857_v21 }
  0x2a   :  { %563 = vmatpush.bf16.msrb.mxu2 %v865_v22 }
  0x2b   :  { %536 = vmatpush.bf16.msrb.mxu0 %v848_v23 }
  0x2d   :  { %550 = vmatpush.bf16.msrb.mxu1 %v856_v24 }
  0x2e   :  { %564 = vmatpush.bf16.msrb.mxu2 %v864_v25 }
  0x2f   :  { %537 = vmatpush.bf16.msrb.mxu0 %v847_v26 }
  0x31   :  { %551 = vmatpush.bf16.msrb.mxu1 %v855_v36 }
  0x32   :  { %565 = vmatpush.bf16.msrb.mxu2 %v863_v37 }
  0x33   :  { %538 = vmatpush.bf16.msrb.mxu0 %v846_v35 }
  0x35   :  { %552 = vmatpush.bf16.msrb.mxu1 %v854_v39 }
  0x36   :  { %566 = vmatpush.bf16.msrb.mxu2 %v862_v40 }
  0x37   :  { %539 = vmatpush.bf16.msrb.mxu0 %v845_v38 }
  0x39   :  { %553 = vmatpush.bf16.msrb.mxu1 %v853_v42 }
  0x3a   :  { %567 = vmatpush.bf16.msrb.mxu2 %v861_v43 }
  0x3b   :  { %540 = vmatpush.bf16.msrb.mxu0 %v844_v41 }
  0x3d   :  { %554 = vmatpush.bf16.msrb.mxu1 %v852_v45 }
  0x3e   :  { %568 = vmatpush.bf16.msrb.mxu2 %v860_v46 }
  0x3f   :  { %541 = vmatpush.bf16.msrb.mxu0 %v843_v44 }
  0x41   :  { %555 = vmatpush.bf16.msrb.mxu1 %v851_v47 }
  0x42   :  { %569 = vmatpush.bf16.msrb.mxu2 %v859_v48 }
  0x9e   :  { %v111_v27 = vpop.f32.mrf.mxu0 }
  0x9f   :  { %v112_v29 = vadd.f32 %v867_v28, %v111_v27 }
  0xa1   :  { %v116_v32 = vmax.f32 %v112_v29, 0.0 }
  0xa6   :  { %v113_v30 = vpop.f32.mrf.mxu0 }
  0xa7   :  { %v114_v31 = vadd.f32 %v867_v28, %v113_v30 }
  0xa9   :  { %v117_v33 = vmax.f32 %v114_v31, 0.0 }
  0xab   :  { %v118_v34 = vpack.c.bf16 %v117_v33, %v116_v32 }
  0xad   :  { %295 = vmatmul.bf16.vlgmr.msra.gmra.mxu1 %v118_v34  ;;  %309 = vmatmul.bf16.vlgmr.msra.gmra.mxu2 %v118_v34 }
  0xae   :  { %323 = vmatmul.bf16.vlgmr.msra.gmra.mxu3 %v118_v34 }
 0x12a   :  { %v296_v50 = vpop.f32.mrf.mxu1 }
 0x12b   :  { %v297_v53 = vadd.f32 %v296_v50, %v153_v51 }
 0x12d   :  { %v329_v59 = vmax.f32 %v297_v53, 0.0 }
 0x130   :  { %v310_v52 = vpop.f32.mrf.mxu2 }
 0x131   :  { %v324_v54 = vpop.f32.mrf.mxu3  ;;  %v311_v61 = vadd.f32 %v310_v52, %v154_v56 }
 0x132   :  { %v298_v55 = vpop.f32.mrf.mxu1  ;;  %v325_v63 = vadd.f32 %v324_v54, %v155_v58 }
 0x133   :  { %v299_v57 = vadd.f32 %v298_v55, %v153_v51  ;;  %v330_v4 = vmax.f32 %v311_v61, 0.0 }
 0x134   :  { %v331_v6 = vmax.f32 %v325_v63, 0.0 }
 0x135   :  { %v332_v60 = vmax.f32 %v299_v57, 0.0 }
 0x137   :  { %v335_v62 = vpack.c.bf16 %v332_v60, %v329_v59 }
 0x138   :  { %v312_v0 = vpop.f32.mrf.mxu2 }
 0x139   :  { %v313_v1 = vadd.f32 %v312_v0, %v154_v56  ;;  %v326_v2 = vpop.f32.mrf.mxu3  ;;  %542 = vmatmul.bf16.vlgmr.msrb.gmra.mxu0 %v335_v62 }
 0x13a   :  { %v327_v3 = vadd.f32 %v326_v2, %v155_v58 }
 0x13b   :  { %v333_v5 = vmax.f32 %v313_v1, 0.0 }
 0x13c   :  { %v334_v7 = vmax.f32 %v327_v3, 0.0 }
 0x13d   :  { %v336_v8 = vpack.c.bf16 %v333_v5, %v330_v4 }
 0x13e   :  { %v337_v9 = vpack.c.bf16 %v334_v7, %v331_v6 }
 0x13f   :  { %556 = vmatmul.bf16.vlgmr.msrb.gmra.mxu1 %v336_v8 }
 0x140   :  { %570 = vmatmul.bf16.vlgmr.msrb.gmra.mxu2 %v337_v9 }
 0x1b6   :  { %v543_v10 = vpop.f32.mrf.mxu0 }
 0x1b7   :  { %v544_v13 = vadd.f32 %v868_v11, %v543_v10 }
 0x1bc   :  { %v557_v12 = vpop.f32.mrf.mxu1 }
 0x1bd   :  { %v558_v14 = vadd.f32 %v557_v12, %v544_v13 }
 0x1be   :  { %v545_v17 = vpop.f32.mrf.mxu0 }
 0x1bf   :  { %v546_v19 = vadd.f32 %v868_v11, %v545_v17 }
 0x1c3   :  { %v571_v15 = vpop.f32.mrf.mxu2 }
 0x1c4   :  { %v572_v16 = vadd.f32 %v571_v15, %v558_v14  ;;  %v559_v18 = vpop.f32.mrf.mxu1 }
 0x1c5   :  { %v560_v20 = vadd.f32 %v559_v18, %v546_v19 }
 0x1c6   :  { %576 = vst [vmem:[%s1174_s7] sm:$0xff] %v572_v16 }
 0x1cb   :  { %v573_v21 = vpop.f32.mrf.mxu2 }
 0x1cc   :  { %v574_v22 = vadd.f32 %v573_v21, %v560_v20 }
 0x1ce   :  { %577 = vst [vmem:[%s1174_s7 + $0x8] sm:$0xff] %v574_v22 }

// kernel: _mlp_forward_impl.1
= control target key start
LH: loop header
LB: loop body
LE: loop exit
PB: predicated region body
PF: predicated region fallthrough
CT: control target
= control target key end

     0   :  { %s1167_s1 = inlined_call_operand.vmem [shape: bf16[128,128], index: 1, kind: input, shape index: {}]   ;;  %s1168_s3 = inlined_call_operand.vmem [shape: bf16[128,384], index: 3, kind: input, shape index: {}]   ;;  %s1169_s2 = inlined_call_operand.vmem [shape: f32[1,128], index: 2, kind: input, shape index: {}]   ;;  %s1170_s0 = inlined_call_operand.vmem [shape: bf16[16,128], index: 0, kind: input, shape index: {}]   ;;  %s1171_s5 = inlined_call_operand.vmem [shape: bf16[384,128], index: 5, kind: input, shape index: {}]   ;;  %s1172_s6 = inlined_call_operand.vmem [shape: f32[1,128], index: 6, kind: input, shape index: {}]   ;;  %s1173_s4 = inlined_call_operand.vmem [shape: f32[1,384], index: 4, kind: input, shape index: {}]   ;;  %s1174_s7 = inlined_call_operand.vmem [shape: f32[16,128], index: 7, kind: output, shape index: {}]  }
   0x1   :  { %v818_v0 = vld [vmem:[%s1167_s1 + $0x38] sm:$0xff]  ;;  %v817_v1 = vld [vmem:[%s1167_s1 + $0x30] sm:$0xff]  ;;  %v704_v2 = vld [vmem:[%s1168_s3 + $0xa8] sm:$0xf] }
   0x2   :  { %102 = vmatpush.bf16.msra.mxu0 %v818_v0  ;;  %v841_v3 = vld [vmem:[%s1168_s3 + $0xb0] sm:$0xf0]  ;;  %v840_v4 = vld [vmem:[%s1168_s3 + $0xac] sm:$0xf]  ;;  %v706_v7 = vld [vmem:[%s1168_s3 + $0xb4] sm:$0xf0] }
   0x3   :  { %v816_v5 = vld [vmem:[%s1167_s1 + $0x28] sm:$0xff]  ;;  %v705_v6 = vor.u32 %v841_v3, %v704_v2  ;;  %v712_v8 = vld [vmem:[%s1168_s3 + $0xb0] sm:$0xf]  ;;  %v842_v9 = vld [vmem:[%s1168_s3 + $0xb8] sm:$0xf0]  ;;  %v709_v10 = vor.u32 %v840_v4, %v706_v7 }
   0x4   :  { %v713_v11 = vor.u32 %v842_v9, %v712_v8  ;;  %v692_v12 = vld [vmem:[%s1168_s3 + $0x90] sm:$0xf]  ;;  %v838_v13 = vld [vmem:[%s1168_s3 + $0x98] sm:$0xf0]  ;;  %v837_v14 = vld [vmem:[%s1168_s3 + $0x94] sm:$0xf] }
   0x5   :  { %287 = vmatpush.bf16.msra.mxu1 %v705_v6  ;;  %v693_v15 = vor.u32 %v838_v13, %v692_v12  ;;  %v694_v16 = vld [vmem:[%s1168_s3 + $0x9c] sm:$0xf0]  ;;  %v700_v17 = vld [vmem:[%s1168_s3 + $0x98] sm:$0xf]  ;;  %v839_v18 = vld [vmem:[%s1168_s3 + $0xa0] sm:$0xf0]  ;;  %301 = vmatpush.bf16.msra.mxu2 %v709_v10 }
   0x6   :  { %103 = vmatpush.bf16.msra.mxu0 %v817_v1  ;;  %315 = vmatpush.bf16.msra.mxu3 %v713_v11  ;;  %v697_v19 = vor.u32 %v837_v14, %v694_v16  ;;  %v701_v20 = vor.u32 %v839_v18, %v700_v17  ;;  %v680_v21 = vld [vmem:[%s1168_s3 + $0x78] sm:$0xf]  ;;  %v835_v22 = vld [vmem:[%s1168_s3 + $0x80] sm:$0xf0]  ;;  %v834_v23 = vld [vmem:[%s1168_s3 + $0x7c] sm:$0xf] }
   0x7   :  { %v682_v24 = vld [vmem:[%s1168_s3 + $0x84] sm:$0xf0]  ;;  %v688_v25 = vld [vmem:[%s1168_s3 + $0x80] sm:$0xf]  ;;  %v836_v26 = vld [vmem:[%s1168_s3 + $0x88] sm:$0xf0]  ;;  %v681_v28 = vor.u32 %v835_v22, %v680_v21 }
   0x8   :  { %v815_v27 = vld [vmem:[%s1167_s1 + $0x20] sm:$0xff]  ;;  %v685_v30 = vor.u32 %v834_v23, %v682_v24  ;;  %v689_v31 = vor.u32 %v836_v26, %v688_v25  ;;  %v832_v32 = vld [vmem:[%s1168_s3 + $0x68] sm:$0xf0]  ;;  %v670_v34 = vld [vmem:[%s1168_s3 + $0x6c] sm:$0xf0] }
   0x9   :  { %288 = vmatpush.bf16.msra.mxu1 %v693_v15  ;;  %v668_v29 = vld [vmem:[%s1168_s3 + $0x60] sm:$0xf]  ;;  %302 = vmatpush.bf16.msra.mxu2 %v697_v19  ;;  %v831_v33 = vld [vmem:[%s1168_s3 + $0x64] sm:$0xf]  ;;  %v676_v35 = vld [vmem:[%s1168_s3 + $0x68] sm:$0xf] }
   0xa   :  { %104 = vmatpush.bf16.msra.mxu0 %v816_v5  ;;  %316 = vmatpush.bf16.msra.mxu3 %v701_v20  ;;  %v833_v36 = vld [vmem:[%s1168_s3 + $0x70] sm:$0xf0]  ;;  %v814_v37 = vld [vmem:[%s1167_s1 + $0x18] sm:$0xff]  ;;  %v669_v38 = vor.u32 %v832_v32, %v668_v29  ;;  %v673_v39 = vor.u32 %v831_v33, %v670_v34  ;;  %v812_v42 = vld [vmem:[%s1167_s1 + $0x8] sm:$0xff] }
   0xb   :  { %v677_v40 = vor.u32 %v833_v36, %v676_v35  ;;  %v813_v41 = vld [vmem:[%s1167_s1 + $0x10] sm:$0xff]  ;;  %v811_v43 = vld [vmem:[%s1167_s1] sm:$0xff]  ;;  %v656_v45 = vld [vmem:[%s1168_s3 + $0x48] sm:$0xf] }
   0xc   :  { %v810_v44 = vld [vmem:[%s1170_s0] sm:$0xff]  ;;  %v829_v46 = vld [vmem:[%s1168_s3 + $0x50] sm:$0xf0]  ;;  %v828_v47 = vld [vmem:[%s1168_s3 + $0x4c] sm:$0xf] }
   0xd   :  { %289 = vmatpush.bf16.msra.mxu1 %v681_v28  ;;  %303 = vmatpush.bf16.msra.mxu2 %v685_v30  ;;  %v657_v48 = vor.u32 %v829_v46, %v656_v45  ;;  %v658_v49 = vld [vmem:[%s1168_s3 + $0x54] sm:$0xf0]  ;;  %v664_v50 = vld [vmem:[%s1168_s3 + $0x50] sm:$0xf]  ;;  %v830_v51 = vld [vmem:[%s1168_s3 + $0x58] sm:$0xf0] }
   0xe   :  { %105 = vmatpush.bf16.msra.mxu0 %v815_v27  ;;  %317 = vmatpush.bf16.msra.mxu3 %v689_v31  ;;  %v661_v52 = vor.u32 %v828_v47, %v658_v49  ;;  %v665_v53 = vor.u32 %v830_v51, %v664_v50  ;;  %v644_v54 = vld [vmem:[%s1168_s3 + $0x30] sm:$0xf]  ;;  %v826_v55 = vld [vmem:[%s1168_s3 + $0x38] sm:$0xf0]  ;;  %v825_v56 = vld [vmem:[%s1168_s3 + $0x34] sm:$0xf] }
   0xf   :  { %v645_v57 = vor.u32 %v826_v55, %v644_v54  ;;  %v646_v58 = vld [vmem:[%s1168_s3 + $0x3c] sm:$0xf0]  ;;  %v652_v59 = vld [vmem:[%s1168_s3 + $0x38] sm:$0xf]  ;;  %v827_v60 = vld [vmem:[%s1168_s3 + $0x40] sm:$0xf0] }
  0x10   :  { %v649_v61 = vor.u32 %v825_v56, %v646_v58  ;;  %v653_v62 = vor.u32 %v827_v60, %v652_v59  ;;  %v632_v63 = vld [vmem:[%s1168_s3 + $0x18] sm:$0xf]  ;;  %v823_v0 = vld [vmem:[%s1168_s3 + $0x20] sm:$0xf0]  ;;  %v822_v1 = vld [vmem:[%s1168_s3 + $0x1c] sm:$0xf] }
  0x11   :  { %290 = vmatpush.bf16.msra.mxu1 %v669_v38  ;;  %304 = vmatpush.bf16.msra.mxu2 %v673_v39  ;;  %v633_v2 = vor.u32 %v823_v0, %v632_v63  ;;  %v634_v3 = vld [vmem:[%s1168_s3 + $0x24] sm:$0xf0]  ;;  %v640_v4 = vld [vmem:[%s1168_s3 + $0x20] sm:$0xf]  ;;  %v824_v5 = vld [vmem:[%s1168_s3 + $0x28] sm:$0xf0] }
  0x12   :  { %106 = vmatpush.bf16.msra.mxu0 %v814_v37  ;;  %318 = vmatpush.bf16.msra.mxu3 %v677_v40  ;;  %v637_v6 = vor.u32 %v822_v1, %v634_v3  ;;  %v641_v7 = vor.u32 %v824_v5, %v640_v4  ;;  %v620_v8 = vld [vmem:[%s1168_s3] sm:$0xf]  ;;  %v820_v9 = vld [vmem:[%s1168_s3 + $0x8] sm:$0xf0]  ;;  %v819_v10 = vld [vmem:[%s1168_s3 + $0x4] sm:$0xf] }
  0x13   :  { %v621_v11 = vor.u32 %v820_v9, %v620_v8  ;;  %v622_v12 = vld [vmem:[%s1168_s3 + $0xc] sm:$0xf0]  ;;  %v628_v13 = vld [vmem:[%s1168_s3 + $0x8] sm:$0xf]  ;;  %v821_v14 = vld [vmem:[%s1168_s3 + $0x10] sm:$0xf0] }
  0x14   :  { %v625_v15 = vor.u32 %v819_v10, %v622_v12  ;;  %v629_v16 = vor.u32 %v821_v14, %v628_v13  ;;  %v850_v17 = vld [vmem:[%s1171_s5 + $0x38] sm:$0xff]  ;;  %v849_v20 = vld [vmem:[%s1171_s5 + $0x30] sm:$0xff]  ;;  %v848_v23 = vld [vmem:[%s1171_s5 + $0x28] sm:$0xff] }
  0x15   :  { %291 = vmatpush.bf16.msra.mxu1 %v657_v48  ;;  %305 = vmatpush.bf16.msra.mxu2 %v661_v52  ;;  %v858_v18 = vld [vmem:[%s1171_s5 + $0x78] sm:$0xff]  ;;  %v857_v21 = vld [vmem:[%s1171_s5 + $0x70] sm:$0xff]  ;;  %v856_v24 = vld [vmem:[%s1171_s5 + $0x68] sm:$0xff] }
  0x16   :  { %107 = vmatpush.bf16.msra.mxu0 %v813_v41  ;;  %319 = vmatpush.bf16.msra.mxu3 %v665_v53  ;;  %v866_v19 = vld [vmem:[%s1171_s5 + $0xb8] sm:$0xff]  ;;  %v865_v22 = vld [vmem:[%s1171_s5 + $0xb0] sm:$0xff]  ;;  %v864_v25 = vld [vmem:[%s1171_s5 + $0xa8] sm:$0xff] }
  0x17   :  { %v847_v26 = vld [vmem:[%s1171_s5 + $0x20] sm:$0xff]  ;;  %v846_v35 = vld [vmem:[%s1171_s5 + $0x18] sm:$0xff]  ;;  %v845_v38 = vld [vmem:[%s1171_s5 + $0x10] sm:$0xff] }
  0x18   :  { %v867_v28 = vld [vmem:[%s1169_s2] ss:$0 sm:$0xff]  ;;  %v854_v39 = vld [vmem:[%s1171_s5 + $0x58] sm:$0xff]  ;;  %v844_v41 = vld [vmem:[%s1171_s5 + $0x8] sm:$0xff] }
  0x19   :  { %292 = vmatpush.bf16.msra.mxu1 %v645_v57  ;;  %306 = vmatpush.bf16.msra.mxu2 %v649_v61  ;;  %v855_v36 = vld [vmem:[%s1171_s5 + $0x60] sm:$0xff]  ;;  %v862_v40 = vld [vmem:[%s1171_s5 + $0x98] sm:$0xff]  ;;  %v852_v45 = vld [vmem:[%s1171_s5 + $0x48] sm:$0xff] }
  0x1a   :  { %108 = vmatpush.bf16.msra.mxu0 %v812_v42  ;;  %320 = vmatpush.bf16.msra.mxu3 %v653_v62  ;;  %v863_v37 = vld [vmem:[%s1171_s5 + $0xa0] sm:$0xff]  ;;  %v853_v42 = vld [vmem:[%s1171_s5 + $0x50] sm:$0xff]  ;;  %v860_v46 = vld [vmem:[%s1171_s5 + $0x88] sm:$0xff] }
  0x1b   :  { %v851_v47 = vld [vmem:[%s1171_s5 + $0x40] sm:$0xff] }
  0x1c   :  { %v859_v48 = vld [vmem:[%s1171_s5 + $0x80] sm:$0xff] }
  0x1d   :  { %293 = vmatpush.bf16.msra.mxu1 %v633_v2  ;;  %307 = vmatpush.bf16.msra.mxu2 %v637_v6  ;;  %v151_v49 = vld [vmem:[%s1173_s4] sm:$0x7] }
  0x1e   :  { %109 = vmatpush.bf16.msra.mxu0 %v811_v43  ;;  %321 = vmatpush.bf16.msra.mxu3 %v641_v7  ;;  %v861_v43 = vld [vmem:[%s1171_s5 + $0x90] sm:$0xff]  ;;  %v153_v51 = vperm.slane %v151_v49, 0  ;;  %v154_v56 = vperm.slane %v151_v49, 1  ;;  %v155_v58 = vperm.slane %v151_v49, 2 }
  0x21   :  { %110 = vmatmul.bf16.vlgmr.msra.gmra.mxu0 %v810_v44  ;;  %294 = vmatpush.bf16.msra.mxu1 %v621_v11  ;;  %v843_v44 = vld [vmem:[%s1171_s5] sm:$0xff] }
  0x22   :  { %308 = vmatpush.bf16.msra.mxu2 %v625_v15  ;;  %322 = vmatpush.bf16.msra.mxu3 %v629_v16  ;;  %v868_v11 = vld [vmem:[%s1172_s6] ss:$0 sm:$0xff] }
  0x23   :  { %534 = vmatpush.bf16.msrb.mxu0 %v850_v17 }
  0x25   :  { %548 = vmatpush.bf16.msrb.mxu1 %v858_v18 }
  0x26   :  { %562 = vmatpush.bf16.msrb.mxu2 %v866_v19 }
  0x27   :  { %535 = vmatpush.bf16.msrb.mxu0 %v849_v20 }
  0x29   :  { %549 = vmatpush.bf16.msrb.mxu1 %v857_v21 }
  0x2a   :  { %563 = vmatpush.bf16.msrb.mxu2 %v865_v22 }
  0x2b   :  { %536 = vmatpush.bf16.msrb.mxu0 %v848_v23 }
  0x2d   :  { %550 = vmatpush.bf16.msrb.mxu1 %v856_v24 }
  0x2e   :  { %564 = vmatpush.bf16.msrb.mxu2 %v864_v25 }
  0x2f   :  { %537 = vmatpush.bf16.msrb.mxu0 %v847_v26 }
  0x31   :  { %551 = vmatpush.bf16.msrb.mxu1 %v855_v36 }
  0x32   :  { %565 = vmatpush.bf16.msrb.mxu2 %v863_v37 }
  0x33   :  { %538 = vmatpush.bf16.msrb.mxu0 %v846_v35 }
  0x35   :  { %552 = vmatpush.bf16.msrb.mxu1 %v854_v39 }
  0x36   :  { %566 = vmatpush.bf16.msrb.mxu2 %v862_v40 }
  0x37   :  { %539 = vmatpush.bf16.msrb.mxu0 %v845_v38 }
  0x39   :  { %553 = vmatpush.bf16.msrb.mxu1 %v853_v42 }
  0x3a   :  { %567 = vmatpush.bf16.msrb.mxu2 %v861_v43 }
  0x3b   :  { %540 = vmatpush.bf16.msrb.mxu0 %v844_v41 }
  0x3d   :  { %554 = vmatpush.bf16.msrb.mxu1 %v852_v45 }
  0x3e   :  { %568 = vmatpush.bf16.msrb.mxu2 %v860_v46 }
  0x3f   :  { %541 = vmatpush.bf16.msrb.mxu0 %v843_v44 }
  0x41   :  { %555 = vmatpush.bf16.msrb.mxu1 %v851_v47 }
  0x42   :  { %569 = vmatpush.bf16.msrb.mxu2 %v859_v48 }
  0x9e   :  { %v111_v27 = vpop.f32.mrf.mxu0 }
  0x9f   :  { %v112_v29 = vadd.f32 %v867_v28, %v111_v27 }
  0xa1   :  { %v116_v32 = vmax.f32 %v112_v29, 0.0 }
  0xa6   :  { %v113_v30 = vpop.f32.mrf.mxu0 }
  0xa7   :  { %v114_v31 = vadd.f32 %v867_v28, %v113_v30 }
  0xa9   :  { %v117_v33 = vmax.f32 %v114_v31, 0.0 }
  0xab   :  { %v118_v34 = vpack.c.bf16 %v117_v33, %v116_v32 }
  0xad   :  { %295 = vmatmul.bf16.vlgmr.msra.gmra.mxu1 %v118_v34  ;;  %309 = vmatmul.bf16.vlgmr.msra.gmra.mxu2 %v118_v34 }
  0xae   :  { %323 = vmatmul.bf16.vlgmr.msra.gmra.mxu3 %v118_v34 }
 0x12a   :  { %v296_v50 = vpop.f32.mrf.mxu1 }
 0x12b   :  { %v297_v53 = vadd.f32 %v296_v50, %v153_v51 }
 0x12d   :  { %v329_v59 = vmax.f32 %v297_v53, 0.0 }
 0x130   :  { %v310_v52 = vpop.f32.mrf.mxu2 }
 0x131   :  { %v324_v54 = vpop.f32.mrf.mxu3  ;;  %v311_v61 = vadd.f32 %v310_v52, %v154_v56 }
 0x132   :  { %v298_v55 = vpop.f32.mrf.mxu1  ;;  %v325_v63 = vadd.f32 %v324_v54, %v155_v58 }
 0x133   :  { %v299_v57 = vadd.f32 %v298_v55, %v153_v51  ;;  %v330_v4 = vmax.f32 %v311_v61, 0.0 }
 0x134   :  { %v331_v6 = vmax.f32 %v325_v63, 0.0 }
 0x135   :  { %v332_v60 = vmax.f32 %v299_v57, 0.0 }
 0x137   :  { %v335_v62 = vpack.c.bf16 %v332_v60, %v329_v59 }
 0x138   :  { %v312_v0 = vpop.f32.mrf.mxu2 }
 0x139   :  { %v313_v1 = vadd.f32 %v312_v0, %v154_v56  ;;  %v326_v2 = vpop.f32.mrf.mxu3  ;;  %542 = vmatmul.bf16.vlgmr.msrb.gmra.mxu0 %v335_v62 }
 0x13a   :  { %v327_v3 = vadd.f32 %v326_v2, %v155_v58 }
 0x13b   :  { %v333_v5 = vmax.f32 %v313_v1, 0.0 }
 0x13c   :  { %v334_v7 = vmax.f32 %v327_v3, 0.0 }
 0x13d   :  { %v336_v8 = vpack.c.bf16 %v333_v5, %v330_v4 }
 0x13e   :  { %v337_v9 = vpack.c.bf16 %v334_v7, %v331_v6 }
 0x13f   :  { %556 = vmatmul.bf16.vlgmr.msrb.gmra.mxu1 %v336_v8 }
 0x140   :  { %570 = vmatmul.bf16.vlgmr.msrb.gmra.mxu2 %v337_v9 }
 0x1b6   :  { %v543_v10 = vpop.f32.mrf.mxu0 }
 0x1b7   :  { %v544_v13 = vadd.f32 %v868_v11, %v543_v10 }
 0x1bc   :  { %v557_v12 = vpop.f32.mrf.mxu1 }
 0x1bd   :  { %v558_v14 = vadd.f32 %v557_v12, %v544_v13 }
 0x1be   :  { %v545_v17 = vpop.f32.mrf.mxu0 }
 0x1bf   :  { %v546_v19 = vadd.f32 %v868_v11, %v545_v17 }
 0x1c3   :  { %v571_v15 = vpop.f32.mrf.mxu2 }
 0x1c4   :  { %v572_v16 = vadd.f32 %v571_v15, %v558_v14  ;;  %v559_v18 = vpop.f32.mrf.mxu1 }
 0x1c5   :  { %v560_v20 = vadd.f32 %v559_v18, %v546_v19 }
 0x1c6   :  { %576 = vst [vmem:[%s1174_s7] sm:$0xff] %v572_v16 }
 0x1cb   :  { %v573_v21 = vpop.f32.mrf.mxu2 }
 0x1cc   :  { %v574_v22 = vadd.f32 %v573_v21, %v560_v20 }
 0x1ce   :  { %577 = vst [vmem:[%s1174_s7 + $0x8] sm:$0xff] %v574_v22 }

</bundles_post_ra>
